<compile_context>
chip_gen: v6e
topology: v6e:2x2x1
jax: 0.10.0
libtpu: 0.0.40
codegen_flags: <defaults>
</compile_context>

<pallas_src>
import functools

import jax
import jax.numpy as jnp
import numpy as np
from jax import lax
from jax.experimental import pallas as pl
from jax.experimental.pallas import tpu as pltpu


def _round_up(x, m):
    return ((x + m - 1) // m) * m


# ------------------------------ fused TextCNN kernel -------------------------------
def _textcnn_kernel(tgt_ref, bank_ref, bc_ref, tval_ref,
                    w1_ref, b1_ref, w2_ref, b2_ref, w3_ref, b3_ref,
                    o_ref, *, B_TILE, T):
    BT, Kw = tgt_ref.shape                       # (B_TILE*T, Wmax*V_pad)
    D0p = bank_ref.shape[1]

    # 1) Embedding + conv in one shot: lane-dense one-hot (targets already carry the
    #    per-offset K shift) against the folded Emb@Conv bank.  Pad ids hit zero rows,
    #    offsets past a window's width hit zero columns.
    onehot = (tgt_ref[...] == lax.broadcasted_iota(jnp.int32, (BT, Kw), 1)
              ).astype(jnp.bfloat16)                                        # (BT, Kw)
    s = jnp.dot(onehot, bank_ref[...], preferred_element_type=jnp.float32)  # (BT, D0p)
    s = jnp.maximum(s + bc_ref[...], 0.0)                                   # conv bias + ReLU

    # 2) Max over valid time steps per window group.  ReLU >= 0, so masking invalid
    #    positions (and padded filter columns, tval == 0) to 0 is exact.
    tmask = lax.broadcasted_iota(jnp.int32, (T, D0p), 0) < tval_ref[...]    # (T, D0p)
    s3 = s.reshape(B_TILE, T, D0p)                # layout-free: T is a multiple of 8
    feats = jnp.max(jnp.where(tmask[None, :, :], s3, 0.0), axis=1)          # (B_TILE, D0p)

    # 3) Classifier MLP (Dropout is identity at inference).
    h = jnp.dot(feats.astype(jnp.bfloat16), w1_ref[...],
                preferred_element_type=jnp.float32) + b1_ref[...]
    h = jnp.maximum(h, 0.0)
    h = jnp.dot(h.astype(jnp.bfloat16), w2_ref[...],
                preferred_element_type=jnp.float32) + b2_ref[...]
    h = jnp.maximum(h, 0.0)
    o_ref[...] = jnp.dot(h.astype(jnp.bfloat16), w3_ref[...],
                         preferred_element_type=jnp.float32) + b3_ref[...]


# ------------------------------- params + packing ----------------------------------
def init_params(key, vocab_size, emb_dim, windows, filter_num, hiddens, class_num):
    keys = jax.random.split(key, 1 + len(windows) + 3)
    p = {}
    p["emb"] = 0.02 * jax.random.normal(keys[0], (vocab_size, emb_dim), jnp.float32)
    p["conv_w"], p["conv_b"] = [], []
    for i, w in enumerate(windows):
        kw, kb = jax.random.split(keys[1 + i])
        # (w*E, F): row i*E+e corresponds to Conv2d weight [f, 0, i, e].
        p["conv_w"].append(0.1 * jax.random.normal(kw, (w * emb_dim, filter_num), jnp.float32))
        p["conv_b"].append(0.01 * jax.random.normal(kb, (1, filter_num), jnp.float32))
    dims = [filter_num * len(windows)] + list(hiddens) + [class_num]
    for li in range(3):
        kw, kb = jax.random.split(keys[1 + len(windows) + li])
        p[f"w{li+1}"] = 0.1 * jax.random.normal(kw, (dims[li], dims[li + 1]), jnp.float32)
        p[f"b{li+1}"] = 0.01 * jax.random.normal(kb, (1, dims[li + 1]), jnp.float32)
    return p


def pack_params(p, *, seq_len, emb_dim, windows, filter_num, hiddens, class_num, vocab_size):
    """One-time packing: fold Emb into the conv filters, and zero-pad every dim so all
    in-kernel dots / stores are lane-dense."""
    E, F = emb_dim, filter_num
    Wmax, Wmin = max(windows), min(windows)
    T = _round_up(seq_len - Wmin + 1, 8)          # pooled-time tile, multiple of 8 sublanes
    Vp = _round_up(vocab_size + 1, 128)           # vocab + pad-id row, lane-dense
    D0 = F * len(windows)
    D0p = _round_up(D0, 128)
    H1p = _round_up(hiddens[0], 128)
    H2p = _round_up(hiddens[1], 128)
    Cp = _round_up(class_num, 128)

    # Folded Emb@Conv bank: rows indexed by (offset i, vocab v); pad-id / unused offset
    # rows and padded filter columns stay zero.
    # TODO(synk): at real vocab sizes on v7x (64 MiB VMEM) this folded table should be
    # replaced by a scalar-prefetch row gather instead of any one-hot matmul.
    bank = jnp.zeros((Wmax * Vp, D0p), jnp.float32)
    bc = jnp.zeros((1, D0p), jnp.float32)
    tval = jnp.zeros((1, D0p), jnp.int32)
    for g, w in enumerate(windows):
        for i in range(w):
            a_i = p["emb"] @ p["conv_w"][g][i * E:(i + 1) * E, :]          # (V, F)
            bank = bank.at[i * Vp:i * Vp + vocab_size, g * F:(g + 1) * F].set(a_i)
        bc = bc.at[:, g * F:(g + 1) * F].set(p["conv_b"][g])
        tval = tval.at[:, g * F:(g + 1) * F].set(seq_len - w + 1)

    def pad2(a, r, c):
        return jnp.zeros((r, c), jnp.float32).at[:a.shape[0], :a.shape[1]].set(a)

    packed = {
        "bank": bank.astype(jnp.bfloat16),
        "bc": bc,
        "tval": tval,
        "w1": pad2(p["w1"], D0p, H1p).astype(jnp.bfloat16),
        "b1": pad2(p["b1"], 1, H1p),
        "w2": pad2(p["w2"], H1p, H2p).astype(jnp.bfloat16),
        "b2": pad2(p["b2"], 1, H2p),
        "w3": pad2(p["w3"], H2p, Cp).astype(jnp.bfloat16),
        "b3": pad2(p["b3"], 1, Cp),
    }
    meta = dict(seq_len=seq_len, T=T, Vp=Vp, Wmax=Wmax,
                class_num=class_num, vocab_size=vocab_size)
    return packed, meta


# ------------------------------------ forward ---------------------------------------
def forward(packed, x_ids, *, seq_len, T, Vp, Wmax, class_num, vocab_size):
    B = x_ids.shape[0]
    B_TILE = B if B <= 8 else 8                   # grid over batch tiles (parallel on v7x)
    Bp = _round_up(B, B_TILE)
    S_pad = T + Wmax - 1
    pad_id = vocab_size                           # maps to an all-zero row of every offset block

    ids = jnp.full((Bp, S_pad), pad_id, jnp.int32).at[:B, :seq_len].set(x_ids)
    # id-level im2col with the per-offset K shift baked in -> lane-dense compare targets.
    im2col = jnp.stack([ids[:, i:i + T] + i * Vp for i in range(Wmax)], axis=-1)  # (Bp, T, Wmax)
    tgt = jnp.broadcast_to(im2col.reshape(Bp * T, Wmax, 1),
                           (Bp * T, Wmax, Vp)).reshape(Bp * T, Wmax * Vp)

    Kw = Wmax * Vp
    D0p = packed["bank"].shape[1]
    H1p = packed["w1"].shape[1]
    H2p = packed["w2"].shape[1]
    Cp = packed["w3"].shape[1]

    kernel = functools.partial(_textcnn_kernel, B_TILE=B_TILE, T=T)

    def full(shape):                               # weights: same block every grid step
        return pl.BlockSpec(shape, lambda b: (0, 0))

    out = pl.pallas_call(
        kernel,
        out_shape=jax.ShapeDtypeStruct((Bp, Cp), jnp.float32),
        grid=(Bp // B_TILE,),
        in_specs=[
            pl.BlockSpec((B_TILE * T, Kw), lambda b: (b, 0)),   # im2col targets (batch-tiled)
            full((Kw, D0p)),                                    # folded Emb@Conv bank
            full((1, D0p)),                                     # conv bias
            full((1, D0p)),                                     # valid-time count per column
            full((D0p, H1p)), full((1, H1p)),
            full((H1p, H2p)), full((1, H2p)),
            full((H2p, Cp)), full((1, Cp)),
        ],
        out_specs=pl.BlockSpec((B_TILE, Cp), lambda b: (b, 0)),
        compiler_params=pltpu.CompilerParams(dimension_semantics=("parallel",)),
    )(tgt, packed["bank"], packed["bc"], packed["tval"],
      packed["w1"], packed["b1"], packed["w2"], packed["b2"],
      packed["w3"], packed["b3"])
    return out[:B, :class_num]


# -------------------------- pure-JAX reference (f32) --------------------------------
def reference_forward(p, x_ids, *, seq_len, emb_dim, windows, filter_num):
    emb = p["emb"][x_ids]                                       # (B, S, E)
    B = x_ids.shape[0]
    feats = []
    for g, w in enumerate(windows):
        Tg = seq_len - w + 1
        cols = jnp.concatenate([emb[:, i:i + Tg, :] for i in range(w)], axis=-1)  # (B, Tg, w*E)
        conv = cols.reshape(B * Tg, w * emb_dim) @ p["conv_w"][g] + p["conv_b"][g]
        conv = jnp.maximum(conv, 0.0).reshape(B, Tg, filter_num)
        feats.append(jnp.max(conv, axis=1))
    f = jnp.concatenate(feats, axis=1)                          # (B, 3F)
    h = jnp.maximum(f @ p["w1"] + p["b1"], 0.0)
    h = jnp.maximum(h @ p["w2"] + p["b2"], 0.0)
    return h @ p["w3"] + p["b3"]


if __name__ == "__main__":
    # Small shapes consistent with the module's forward pass.
    batch, seq_len = 2, 16
    vocab_size = 50          # len(vocab_dict) + 1
    emb_dim = 32
    windows = [3, 4, 5]
    filter_num = 16
    hiddens = [64, 32]
    class_num = 4

    key = jax.random.PRNGKey(0)
    k_ids, k_params = jax.random.split(key)
    params = init_params(k_params, vocab_size, emb_dim, windows, filter_num, hiddens, class_num)
    packed, meta = pack_params(params, seq_len=seq_len, emb_dim=emb_dim, windows=windows,
                               filter_num=filter_num, hiddens=hiddens, class_num=class_num,
                               vocab_size=vocab_size)
    x_ids = jax.random.randint(k_ids, (batch, seq_len), 0, vocab_size, dtype=jnp.int32)

    out = forward(packed, x_ids, **meta)
    out = jax.block_until_ready(out)
    assert out.shape == (batch, class_num), out.shape

    ref = reference_forward(params, x_ids, seq_len=seq_len, emb_dim=emb_dim,
                            windows=windows, filter_num=filter_num)
    np.testing.assert_allclose(np.asarray(out), np.asarray(ref), atol=5e-3, rtol=5e-2)

    # TODO(synk): Dropout is identity (inference); training-mode dropout masks not implemented.
    print("KERNEL_OK")
</pallas_src>

<mosaic_0001>
module attributes {stable_mosaic.version = 11 : i64} {
  func.func @_textcnn_kernel(%arg0: i32, %arg1: memref<32x640xi32, #tpu.memory_space<vmem>>, %arg2: memref<640x128xbf16, #tpu.memory_space<vmem>>, %arg3: memref<1x128xf32, #tpu.memory_space<vmem>>, %arg4: memref<1x128xi32, #tpu.memory_space<vmem>>, %arg5: memref<128x128xbf16, #tpu.memory_space<vmem>>, %arg6: memref<1x128xf32, #tpu.memory_space<vmem>>, %arg7: memref<128x128xbf16, #tpu.memory_space<vmem>>, %arg8: memref<1x128xf32, #tpu.memory_space<vmem>>, %arg9: memref<128x128xbf16, #tpu.memory_space<vmem>>, %arg10: memref<1x128xf32, #tpu.memory_space<vmem>>, %arg11: memref<2x128xf32, #tpu.memory_space<vmem>>) attributes {dimension_semantics = [#tpu.dimension_semantics<parallel>], iteration_bounds = array<i64: 1>, scalar_prefetch = 0 : i64, scratch_operands = 0 : i64, tpu.core_type = #tpu.core_type<tc>, window_params = [{transform_indices = @transform_0, window_bounds = array<i64: 32, 640>}, {pipeline_mode = #tpu.pipeline_mode<synchronous>, transform_indices = @transform_1, window_bounds = array<i64: 640, 128>}, {pipeline_mode = #tpu.pipeline_mode<synchronous>, transform_indices = @transform_2, window_bounds = array<i64: 1, 128>}, {pipeline_mode = #tpu.pipeline_mode<synchronous>, transform_indices = @transform_3, window_bounds = array<i64: 1, 128>}, {pipeline_mode = #tpu.pipeline_mode<synchronous>, transform_indices = @transform_4, window_bounds = array<i64: 128, 128>}, {pipeline_mode = #tpu.pipeline_mode<synchronous>, transform_indices = @transform_5, window_bounds = array<i64: 1, 128>}, {pipeline_mode = #tpu.pipeline_mode<synchronous>, transform_indices = @transform_6, window_bounds = array<i64: 128, 128>}, {pipeline_mode = #tpu.pipeline_mode<synchronous>, transform_indices = @transform_7, window_bounds = array<i64: 1, 128>}, {pipeline_mode = #tpu.pipeline_mode<synchronous>, transform_indices = @transform_8, window_bounds = array<i64: 128, 128>}, {pipeline_mode = #tpu.pipeline_mode<synchronous>, transform_indices = @transform_9, window_bounds = array<i64: 1, 128>}, {transform_indices = @transform_10, window_bounds = array<i64: 2, 128>}]} {
    %c0 = arith.constant 0 : index
    %c0_0 = arith.constant 0 : index
    %0 = vector.load %arg1[%c0, %c0_0] : memref<32x640xi32, #tpu.memory_space<vmem>>, vector<32x640xi32>
    %1 = tpu.iota {dimensions = array<i32: 1>} : vector<32x640xi32>
    %2 = arith.cmpi eq, %0, %1 : vector<32x640xi32>
    %3 = arith.extui %2 : vector<32x640xi1> to vector<32x640xi32>
    %4 = arith.sitofp %3 : vector<32x640xi32> to vector<32x640xf32>
    %5 = arith.truncf %4 : vector<32x640xf32> to vector<32x640xbf16>
    %c0_1 = arith.constant 0 : index
    %c0_2 = arith.constant 0 : index
    %6 = vector.load %arg2[%c0_1, %c0_2] : memref<640x128xbf16, #tpu.memory_space<vmem>>, vector<640x128xbf16>
    %cst = arith.constant dense<0.000000e+00> : vector<32x128xf32>
    %7 = tpu.matmul %5, %6, %cst {dimension_numbers = #tpu.dot_dimension_numbers<[1], [0], [0], [1], [0, 0, 1, 1], [], []>} : vector<32x640xbf16>, vector<640x128xbf16>, vector<32x128xf32> -> vector<32x128xf32>
    %c0_3 = arith.constant 0 : index
    %c0_4 = arith.constant 0 : index
    %8 = vector.load %arg3[%c0_3, %c0_4] : memref<1x128xf32, #tpu.memory_space<vmem>>, vector<1x128xf32>
    %9 = vector.broadcast %8 : vector<1x128xf32> to vector<32x128xf32>
    %10 = arith.addf %7, %9 : vector<32x128xf32>
    %cst_5 = arith.constant 0.000000e+00 : f32
    %11 = vector.broadcast %cst_5 : f32 to vector<32x128xf32>
    %12 = arith.maximumf %10, %11 : vector<32x128xf32>
    %13 = tpu.iota {dimensions = array<i32: 0>} : vector<16x128xi32>
    %c0_6 = arith.constant 0 : index
    %c0_7 = arith.constant 0 : index
    %14 = vector.load %arg4[%c0_6, %c0_7] : memref<1x128xi32, #tpu.memory_space<vmem>>, vector<1x128xi32>
    %15 = vector.broadcast %14 : vector<1x128xi32> to vector<16x128xi32>
    %16 = arith.cmpi slt, %13, %15 : vector<16x128xi32>
    %17 = vector.shape_cast %12 : vector<32x128xf32> to vector<2x16x128xf32>
    %18 = vector.shape_cast %16 : vector<16x128xi1> to vector<1x16x128xi1>
    %cst_8 = arith.constant 0.000000e+00 : f32
    %19 = vector.shape_cast %18 : vector<1x16x128xi1> to vector<1x16x128xi1>
    %20 = vector.broadcast %19 : vector<1x16x128xi1> to vector<2x16x128xi1>
    %21 = vector.broadcast %cst_8 : f32 to vector<2x16x128xf32>
    %22 = arith.select %20, %17, %21 : vector<2x16x128xi1>, vector<2x16x128xf32>
    %cst_9 = arith.constant dense<0xFF800000> : vector<2x128xf32>
    %23 = vector.multi_reduction <maximumf>, %22, %cst_9 [1] : vector<2x16x128xf32> to vector<2x128xf32>
    %24 = arith.truncf %23 : vector<2x128xf32> to vector<2x128xbf16>
    %c0_10 = arith.constant 0 : index
    %c0_11 = arith.constant 0 : index
    %25 = vector.load %arg5[%c0_10, %c0_11] : memref<128x128xbf16, #tpu.memory_space<vmem>>, vector<128x128xbf16>
    %cst_12 = arith.constant dense<0.000000e+00> : vector<2x128xf32>
    %26 = tpu.matmul %24, %25, %cst_12 {dimension_numbers = #tpu.dot_dimension_numbers<[1], [0], [0], [1], [0, 0, 1, 1], [], []>} : vector<2x128xbf16>, vector<128x128xbf16>, vector<2x128xf32> -> vector<2x128xf32>
    %c0_13 = arith.constant 0 : index
    %c0_14 = arith.constant 0 : index
    %27 = vector.load %arg6[%c0_13, %c0_14] : memref<1x128xf32, #tpu.memory_space<vmem>>, vector<1x128xf32>
    %28 = vector.broadcast %27 : vector<1x128xf32> to vector<2x128xf32>
    %29 = arith.addf %26, %28 : vector<2x128xf32>
    %cst_15 = arith.constant 0.000000e+00 : f32
    %30 = vector.broadcast %cst_15 : f32 to vector<2x128xf32>
    %31 = arith.maximumf %29, %30 : vector<2x128xf32>
    %32 = arith.truncf %31 : vector<2x128xf32> to vector<2x128xbf16>
    %c0_16 = arith.constant 0 : index
    %c0_17 = arith.constant 0 : index
    %33 = vector.load %arg7[%c0_16, %c0_17] : memref<128x128xbf16, #tpu.memory_space<vmem>>, vector<128x128xbf16>
    %cst_18 = arith.constant dense<0.000000e+00> : vector<2x128xf32>
    %34 = tpu.matmul %32, %33, %cst_18 {dimension_numbers = #tpu.dot_dimension_numbers<[1], [0], [0], [1], [0, 0, 1, 1], [], []>} : vector<2x128xbf16>, vector<128x128xbf16>, vector<2x128xf32> -> vector<2x128xf32>
    %c0_19 = arith.constant 0 : index
    %c0_20 = arith.constant 0 : index
    %35 = vector.load %arg8[%c0_19, %c0_20] : memref<1x128xf32, #tpu.memory_space<vmem>>, vector<1x128xf32>
    %36 = vector.broadcast %35 : vector<1x128xf32> to vector<2x128xf32>
    %37 = arith.addf %34, %36 : vector<2x128xf32>
    %cst_21 = arith.constant 0.000000e+00 : f32
    %38 = vector.broadcast %cst_21 : f32 to vector<2x128xf32>
    %39 = arith.maximumf %37, %38 : vector<2x128xf32>
    %40 = arith.truncf %39 : vector<2x128xf32> to vector<2x128xbf16>
    %c0_22 = arith.constant 0 : index
    %c0_23 = arith.constant 0 : index
    %41 = vector.load %arg9[%c0_22, %c0_23] : memref<128x128xbf16, #tpu.memory_space<vmem>>, vector<128x128xbf16>
    %cst_24 = arith.constant dense<0.000000e+00> : vector<2x128xf32>
    %42 = tpu.matmul %40, %41, %cst_24 {dimension_numbers = #tpu.dot_dimension_numbers<[1], [0], [0], [1], [0, 0, 1, 1], [], []>} : vector<2x128xbf16>, vector<128x128xbf16>, vector<2x128xf32> -> vector<2x128xf32>
    %c0_25 = arith.constant 0 : index
    %c0_26 = arith.constant 0 : index
    %43 = vector.load %arg10[%c0_25, %c0_26] : memref<1x128xf32, #tpu.memory_space<vmem>>, vector<1x128xf32>
    %44 = vector.broadcast %43 : vector<1x128xf32> to vector<2x128xf32>
    %45 = arith.addf %42, %44 : vector<2x128xf32>
    %c0_27 = arith.constant 0 : index
    %c0_28 = arith.constant 0 : index
    %46 = vector.load %arg11[%c0_27, %c0_28] : memref<2x128xf32, #tpu.memory_space<vmem>>, vector<2x128xf32>
    tpu.vector_store %arg11[%c0_27, %c0_28], %45 {strides = array<i32>} : memref<2x128xf32, #tpu.memory_space<vmem>>, vector<2x128xf32>,
    return
  }
  func.func @transform_0(%arg0: i32) -> (i32, i32) {
    %c0_i32 = arith.constant 0 : i32
    %c0_i32_0 = arith.constant 0 : i32
    return %arg0, %c0_i32 : i32, i32
  }
  func.func @transform_1(%arg0: i32) -> (i32, i32) {
    %c0_i32 = arith.constant 0 : i32
    %c0_i32_0 = arith.constant 0 : i32
    %c0_i32_1 = arith.constant 0 : i32
    return %c0_i32, %c0_i32_0 : i32, i32
  }
  func.func @transform_2(%arg0: i32) -> (i32, i32) {
    %c0_i32 = arith.constant 0 : i32
    %c0_i32_0 = arith.constant 0 : i32
    %c0_i32_1 = arith.constant 0 : i32
    return %c0_i32, %c0_i32_0 : i32, i32
  }
  func.func @transform_3(%arg0: i32) -> (i32, i32) {
    %c0_i32 = arith.constant 0 : i32
    %c0_i32_0 = arith.constant 0 : i32
    %c0_i32_1 = arith.constant 0 : i32
    return %c0_i32, %c0_i32_0 : i32, i32
  }
  func.func @transform_4(%arg0: i32) -> (i32, i32) {
    %c0_i32 = arith.constant 0 : i32
    %c0_i32_0 = arith.constant 0 : i32
    %c0_i32_1 = arith.constant 0 : i32
    return %c0_i32, %c0_i32_0 : i32, i32
  }
  func.func @transform_5(%arg0: i32) -> (i32, i32) {
    %c0_i32 = arith.constant 0 : i32
    %c0_i32_0 = arith.constant 0 : i32
    %c0_i32_1 = arith.constant 0 : i32
    return %c0_i32, %c0_i32_0 : i32, i32
  }
  func.func @transform_6(%arg0: i32) -> (i32, i32) {
    %c0_i32 = arith.constant 0 : i32
    %c0_i32_0 = arith.constant 0 : i32
    %c0_i32_1 = arith.constant 0 : i32
    return %c0_i32, %c0_i32_0 : i32, i32
  }
  func.func @transform_7(%arg0: i32) -> (i32, i32) {
    %c0_i32 = arith.constant 0 : i32
    %c0_i32_0 = arith.constant 0 : i32
    %c0_i32_1 = arith.constant 0 : i32
    return %c0_i32, %c0_i32_0 : i32, i32
  }
  func.func @transform_8(%arg0: i32) -> (i32, i32) {
    %c0_i32 = arith.constant 0 : i32
    %c0_i32_0 = arith.constant 0 : i32
    %c0_i32_1 = arith.constant 0 : i32
    return %c0_i32, %c0_i32_0 : i32, i32
  }
  func.func @transform_9(%arg0: i32) -> (i32, i32) {
    %c0_i32 = arith.constant 0 : i32
    %c0_i32_0 = arith.constant 0 : i32
    %c0_i32_1 = arith.constant 0 : i32
    return %c0_i32, %c0_i32_0 : i32, i32
  }
  func.func @transform_10(%arg0: i32) -> (i32, i32) {
    %c0_i32 = arith.constant 0 : i32
    %c0_i32_0 = arith.constant 0 : i32
    return %arg0, %c0_i32 : i32, i32
  }
}

</mosaic_0001>

<bundles_post_ra>
// kernel: tpu_custom_call.1
= control target key start
LH: loop header
LB: loop body
LE: loop exit
PB: predicated region body
PF: predicated region fallthrough
CT: control target
= control target key end

     0   :  { %15 = vsyncpa [#allocation3], 0  ;;  %s1728_s0 = inlined_call_operand.hbm [shape: s32[32,640], index: 0, kind: input, shape index: {}]   ;;  %s1729_s1 = inlined_call_operand.hbm [shape: bf16[640,128], index: 1, kind: input, shape index: {}]   ;;  %s1730_s2 = inlined_call_operand.vmem [shape: f32[1,128], index: 2, kind: input, shape index: {}]   ;;  %s1731_s3 = inlined_call_operand.vmem [shape: s32[1,128], index: 3, kind: input, shape index: {}]   ;;  %s1732_s4 = inlined_call_operand.hbm [shape: bf16[128,128], index: 4, kind: input, shape index: {}]   ;;  %s1733_s5 = inlined_call_operand.vmem [shape: f32[1,128], index: 5, kind: input, shape index: {}]   ;;  %s1734_s6 = inlined_call_operand.hbm [shape: bf16[128,128], index: 6, kind: input, shape index: {}]   ;;  %s1735_s7 = inlined_call_operand.vmem [shape: f32[1,128], index: 7, kind: input, shape index: {}]   ;;  %s1736_s8 = inlined_call_operand.hbm [shape: bf16[128,128], index: 8, kind: input, shape index: {}]   ;;  %s1737_s9 = inlined_call_operand.vmem [shape: f32[1,128], index: 9, kind: input, shape index: {}]   ;;  %s1738_s10 = inlined_call_operand.hbm [shape: f32[2,128], index: 10, kind: output, shape index: {}]  }
   0x1   :  { %16 = vsyncpa [#allocation6], 0 }
   0x2   :  { %17 = vsyncpa [#allocation9], 0 }
   0x3   :  { %18 = vsyncpa [#allocation4], 0  ;;  %s1563_s13 = smov [#allocation5]  }
   0x4   :  { %s36_s14 = sshll.u32 %s1563_s13, 4  ;;  %s37_s14 = int_to_ptr.vmem [resolvable:$true] %s36_s14 }
   0x5   :  { %s1443_s15 = scalar_lea.vmem %s37_s14, 5120  ;;  %p1448_p1 = scmp.lt.s32.totalorder %s37_s14, %s37_s14 }
   0x6   :  { %p1444_p0 = scmp.ne.s32.totalorder %s37_s14, %s1443_s15  ;;  %p1449_p2 = scmp.lt.s32.totalorder %s1443_s15, %s1443_s15 }
   0x8   :  { %p1450_p3 = por %p1449_p2, %p1448_p1 }
   0xa   :  { %p1451_p4 = pnand %p1450_p3, %p1444_p0 }
   0xc   :  { %1454 = shalt.err (!%p1451_p4)
}
   0xd   :  { %s1564_s16 = smov 64   ;;  %s1565_s17 = smov 4  }
   0xe   :  { %42 = dma.hbm_to_vmem [thread:$0]  %s1729_s1, 5120, %s37_s14, [#allocation6], %s1564_s16, %s1564_s16, %s1565_s17  }
   0xf   :  { %s1566_s20 = smov [#allocation8]   ;;  %s1567_s22 = smov [#allocation2]  }
  0x10   :  { %s66_s21 = sshll.u32 %s1566_s20, 4  ;;  %s24_s23 = sshll.u32 %s1567_s22, 4  ;;  %s67_s21 = int_to_ptr.vmem [resolvable:$true] %s66_s21  ;;  %s25_s23 = int_to_ptr.vmem [resolvable:$true] %s24_s23 }
  0x11   :  { %s1463_s24 = scalar_lea.vmem %s67_s21, 1024  ;;  %p1468_p6 = scmp.lt.s32.totalorder %s67_s21, %s67_s21 }
  0x12   :  { %p1464_p5 = scmp.ne.s32.totalorder %s67_s21, %s1463_s24  ;;  %p1469_p7 = scmp.lt.s32.totalorder %s1463_s24, %s1463_s24 }
  0x14   :  { %p1470_p8 = por %p1469_p7, %p1468_p6 }
  0x16   :  { %p1471_p9 = pnand %p1470_p8, %p1464_p5 }
  0x18   :  { %1474 = shalt.err (!%p1471_p9)
}
  0x19   :  { %72 = dma.hbm_to_vmem [thread:$0]  %s1734_s6, 1024, %s67_s21, [#allocation9], %s1564_s16, %s1564_s16, %s1565_s17  }
  0x1a   :  { %s1483_s1 = scalar_lea.vmem %s25_s23, 2560  ;;  %p1488_p11 = scmp.lt.s32.totalorder %s25_s23, %s25_s23 }
  0x1b   :  { %p1484_p10 = scmp.ne.s32.totalorder %s25_s23, %s1483_s1  ;;  %p1489_p12 = scmp.lt.s32.totalorder %s1483_s1, %s1483_s1 }
  0x1d   :  { %p1490_p13 = por %p1489_p12, %p1488_p11 }
  0x1f   :  { %p1491_p0 = pnand %p1490_p13, %p1484_p10 }
  0x21   :  { %1494 = shalt.err (!%p1491_p0)
}
  0x22   :  { %s1568_s27 = smov 640   ;;  %s1569_s28 = smov 40  }
  0x23   :  { %30 = dma.hbm_to_vmem [thread:$0]  %s1728_s0, 2560, %s25_s23, [#allocation3], %s1568_s27, %s1568_s27, %s1569_s28  }
  0x24   :  { %s1570_s11 = smov [#allocation7]   ;;  %s1571_s13 = smov [#allocation10]  }
  0x25   :  { %s52_s12 = sshll.u32 %s1570_s11, 4  ;;  %s80_s14 = sshll.u32 %s1571_s13, 4  ;;  %s53_s12 = int_to_ptr.vmem [resolvable:$true] %s52_s12  ;;  %s81_s14 = int_to_ptr.vmem [resolvable:$true] %s80_s14 }
  0x26   :  { %s1503_s6 = scalar_lea.vmem %s53_s12, 1024  ;;  %p1508_p2 = scmp.lt.s32.totalorder %s53_s12, %s53_s12 }
  0x27   :  { %p1504_p1 = scmp.ne.s32.totalorder %s53_s12, %s1503_s6  ;;  %p1509_p3 = scmp.lt.s32.totalorder %s1503_s6, %s1503_s6 }
  0x29   :  { %p1510_p4 = por %p1509_p3, %p1508_p2 }
  0x2b   :  { %p1511_p5 = pnand %p1510_p4, %p1504_p1 }
  0x2d   :  { %1514 = shalt.err (!%p1511_p5)
}
  0x2e   :  { %58 = dma.hbm_to_vmem [thread:$0]  %s1732_s4, 1024, %s53_s12, [#allocation6], %s1564_s16, %s1564_s16, %s1565_s17  }
  0x2f   :  { %s1523_s0 = scalar_lea.vmem %s81_s14, 1024  ;;  %p1528_p7 = scmp.lt.s32.totalorder %s81_s14, %s81_s14 }
  0x30   :  { %p1524_p6 = scmp.ne.s32.totalorder %s81_s14, %s1523_s0  ;;  %p1529_p8 = scmp.lt.s32.totalorder %s1523_s0, %s1523_s0 }
  0x32   :  { %p1530_p9 = por %p1529_p8, %p1528_p7 }
  0x34   :  { %p1531_p10 = pnand %p1530_p9, %p1524_p6 }
  0x36   :  { %1534 = shalt.err (!%p1531_p10)
}
  0x37   :  { %86 = dma.hbm_to_vmem [thread:$0]  %s1736_s8, 1024, %s81_s14, [#allocation9], %s1564_s16, %s1564_s16, %s1565_s17  }
  0x38   :  { %1555 = dma.done.wait [#allocation3], 2560  }
  0x39   :  { %1556 = vsyncadd [#allocation3], 4294964736 }
  0x3a   :  { %1557 = dma.done.wait [#allocation6], 6144  }
  0x3b   :  { %1558 = vsyncadd [#allocation6], 4294961152 }
  0x3c   :  { %1559 = dma.done.wait [#allocation9], 2048  }
  0x3d   :  { %1560 = vsyncadd [#allocation9], 4294965248  ;;  %v1371_v0 = vld [vmem:[#allocation5 + $0x78] sm:$0xff]   ;;  %v1375_v4 = vld [vmem:[#allocation5 + $0x70] sm:$0xff]   ;;  %v125_v21 = vlaneseq  ;;  %v1572_v41 = vmov 1.0|1.0  }
  0x3e   :  { %v1372_v1 = vld [vmem:[#allocation5 + $0x38] sm:$0xff]   ;;  %1185 = vmatprep.subr.bf16.mxu0 %v1371_v0  ;;  %v1376_v5 = vld [vmem:[#allocation5 + $0x30] sm:$0xff]   ;;  %v1379_v8 = vld [vmem:[#allocation5 + $0x68] sm:$0xff]   ;;  %s1575_s24 = smov [#allocation11]  }
  0x3f   :  { %v1373_v2 = vld [vmem:[#allocation5 + $0xf8] sm:$0xff]   ;;  %1186 = vmatpush3.bf16.msra.mxu0 %v1372_v1  ;;  %v1377_v6 = vld [vmem:[#allocation5 + $0xf0] sm:$0xff]   ;;  %v1380_v9 = vld [vmem:[#allocation5 + $0x28] sm:$0xff]   ;;  %v1659_v26 = vand.u32 127, %v125_v21  ;;  %s1065_s25 = sshll.u32 %s1575_s24, 4  ;;  %s1066_s25 = int_to_ptr.vmem [resolvable:$true] %s1065_s25 }
  0x40   :  { %v1374_v3 = vld [vmem:[#allocation5 + $0xb8] sm:$0xff]   ;;  %1213 = vmatprep.subr.bf16.mxu1 %v1373_v2  ;;  %1187 = vmatprep.subr.bf16.mxu0 %v1375_v4  ;;  %v1378_v7 = vld [vmem:[#allocation5 + $0xb0] sm:$0xff]   ;;  %v1381_v10 = vld [vmem:[#allocation5 + $0xe8] sm:$0xff]   ;;  %v1573_v4 = vmov 0.0   ;;  %p1540_p12 = scmp.lt.s32.totalorder %s1066_s25, %s1066_s25 }
  0x41   :  { %1214 = vmatpush3.bf16.msra.mxu1 %v1374_v3  ;;  %v1382_v11 = vld [vmem:[#allocation5 + $0xa8] sm:$0xff]   ;;  %v1383_v12 = vld [vmem:[#allocation5 + $0x60] sm:$0xff]   ;;  %v1387_v16 = vld [vmem:[#allocation5 + $0x58] sm:$0xff]   ;;  %v127_v31 = vadd.s32 128, %v1659_v26  ;;  %v129_v36 = vadd.s32 384, %v1659_v26  ;;  %v128_v39 = vadd.s32 256, %v1659_v26 }
  0x42   :  { %1215 = vmatprep.subr.bf16.mxu1 %v1377_v6  ;;  %v1384_v13 = vld [vmem:[#allocation5 + $0x20] sm:$0xff]   ;;  %v1388_v17 = vld [vmem:[#allocation5 + $0x18] sm:$0xff]   ;;  %v1391_v20 = vld [vmem:[#allocation5 + $0x50] sm:$0xff]   ;;  %v130_v58 = vadd.s32 512, %v1659_v26 }
  0x43   :  { %1188 = vmatpush3.bf16.msra.mxu0 %v1376_v5  ;;  %v1385_v14 = vld [vmem:[#allocation5 + $0xe0] sm:$0xff]   ;;  %v1389_v18 = vld [vmem:[#allocation5 + $0xd8] sm:$0xff]   ;;  %v1392_v22 = vld [vmem:[#allocation5 + $0x10] sm:$0xff]  }
  0x44   :  { %1189 = vmatprep.subr.bf16.mxu0 %v1379_v8  ;;  %v1386_v15 = vld [vmem:[#allocation5 + $0xa0] sm:$0xff]   ;;  %v1390_v19 = vld [vmem:[#allocation5 + $0x98] sm:$0xff]   ;;  %v1393_v23 = vld [vmem:[#allocation5 + $0xd0] sm:$0xff]  }
  0x45   :  { %1216 = vmatpush3.bf16.msra.mxu1 %v1378_v7  ;;  %v1394_v24 = vld [vmem:[#allocation5 + $0x90] sm:$0xff]   ;;  %v1395_v25 = vld [vmem:[#allocation5 + $0x48] sm:$0xff]   ;;  %v1399_v30 = vld [vmem:[#allocation5 + $0x40] sm:$0xff]  }
  0x46   :  { %1217 = vmatprep.subr.bf16.mxu1 %v1381_v10  ;;  %v1396_v27 = vld [vmem:[#allocation5 + $0x8] sm:$0xff]   ;;  %v1400_v32 = vld [vmem:[#allocation5] sm:$0xff]   ;;  %v111_v35 = vld [vmem:[#allocation2 + $0x30] sm:$0xff] }
  0x47   :  { %1190 = vmatpush3.bf16.msra.mxu0 %v1380_v9  ;;  %v1397_v28 = vld [vmem:[#allocation5 + $0xc8] sm:$0xff]   ;;  %v1401_v33 = vld [vmem:[#allocation5 + $0xc0] sm:$0xff]   ;;  %vm137_vm1 = vcmp.eq.s32.totalorder %v111_v35, %v127_v31  ;;  %v1403_v42 = vld [vmem:[#allocation5 + $0x138] sm:$0xff]  }
  0x48   :  { %1191 = vmatprep.subr.bf16.mxu0 %v1383_v12  ;;  %v1398_v29 = vld [vmem:[#allocation5 + $0x88] sm:$0xff]   ;;  %v1402_v37 = vld [vmem:[#allocation5 + $0x80] sm:$0xff]   ;;  %v108_v43 = vld [vmem:[#allocation2 + $0x18] sm:$0xff] }
  0x49   :  { %1218 = vmatpush3.bf16.msra.mxu1 %v1382_v11  ;;  %v106_v34 = vld [vmem:[#allocation2 + $0x8] sm:$0xff]  ;;  %v105_v38 = vld [vmem:[#allocation2] sm:$0xff]  ;;  %vm134_vm6 = vcmp.eq.s32.totalorder %v108_v43, %v129_v36  ;;  %v107_v45 = vld [vmem:[#allocation2 + $0x10] sm:$0xff] }
  0x4a   :  { %1219 = vmatprep.subr.bf16.mxu1 %v1385_v14  ;;  %vm132_vm0 = vcmp.eq.s32.totalorder %v106_v34, %v127_v31  ;;  %v110_v40 = vld [vmem:[#allocation2 + $0x28] sm:$0xff]  ;;  %vm131_vm3 = vcmp.eq.s32.totalorder %v105_v38, %v1659_v26  ;;  %v113_v44 = vld [vmem:[#allocation2 + $0x40] sm:$0xff]  ;;  %v112_v46 = vld [vmem:[#allocation2 + $0x38] sm:$0xff]  ;;  %vm133_vm8 = vcmp.eq.s32.totalorder %v107_v45, %v128_v39 }
  0x4b   :  { %1192 = vmatpush3.bf16.msra.mxu0 %v1384_v13  ;;  %vm1137_vm2 = vmpackc.low %vm137_vm1, %vm132_vm0  ;;  %vm136_vm4 = vcmp.eq.s32.totalorder %v110_v40, %v1659_v26  ;;  %vm139_vm7 = vcmp.eq.s32.totalorder %v113_v44, %v129_v36  ;;  %vm138_vm10 = vcmp.eq.s32.totalorder %v112_v46, %v128_v39  ;;  %v1404_v47 = vld [vmem:[#allocation5 + $0x130] sm:$0xff]   ;;  %v1405_v48 = vld [vmem:[#allocation5 + $0x128] sm:$0xff]  }
  0x4c   :  { %1193 = vmatprep.subr.bf16.mxu0 %v1387_v16  ;;  %1138 = vmatprep.mubr.msk.bf16.mxu0 %vm1137_vm2, %v1572_v41  ;;  %vm1139_vm5 = vmpackc.low %vm136_vm4, %vm131_vm3  ;;  %v1406_v49 = vld [vmem:[#allocation5 + $0x120] sm:$0xff]   ;;  %v116_v50 = vld [vmem:[#allocation2 + $0x58] sm:$0xff] }
  0x4d   :  { %1220 = vmatpush3.bf16.msra.mxu1 %v1386_v15  ;;  %vm1145_vm9 = vmpackc.low %vm139_vm7, %vm134_vm6  ;;  %v121_v51 = vld [vmem:[#allocation2 + $0x80] sm:$0xff]  ;;  %v115_v52 = vld [vmem:[#allocation2 + $0x50] sm:$0xff]  ;;  %vm142_vm12 = vcmp.eq.s32.totalorder %v116_v50, %v127_v31 }
  0x4e   :  { %1221 = vmatprep.subr.bf16.mxu1 %v1389_v18  ;;  %1146 = vmatprep.mubr.msk.bf16.mxu1 %vm1145_vm9, %v1572_v41  ;;  %vm1147_vm11 = vmpackc.low %vm138_vm10, %vm133_vm8  ;;  %vm147_vm13 = vcmp.eq.s32.totalorder %v121_v51, %v127_v31  ;;  %v120_v53 = vld [vmem:[#allocation2 + $0x78] sm:$0xff]  ;;  %vm141_vm14 = vcmp.eq.s32.totalorder %v115_v52, %v1659_v26  ;;  %v118_v54 = vld [vmem:[#allocation2 + $0x68] sm:$0xff] }
  0x4f   :  { %1194 = vmatpush3.bf16.msra.mxu0 %v1388_v17  ;;  %v123_v55 = vld [vmem:[#allocation2 + $0x90] sm:$0xff]  ;;  %vm1141_vm15 = vmpackc.low %vm147_vm13, %vm142_vm12  ;;  %vm146_vm0 = vcmp.eq.s32.totalorder %v120_v53, %v1659_v26  ;;  %vm144_vm1 = vcmp.eq.s32.totalorder %v118_v54, %v129_v36  ;;  %v117_v56 = vld [vmem:[#allocation2 + $0x60] sm:$0xff] }
  0x50   :  { %1195 = vmatprep.subr.bf16.mxu0 %v1391_v20  ;;  %vm149_vm2 = vcmp.eq.s32.totalorder %v123_v55, %v129_v36  ;;  %v122_v57 = vld [vmem:[#allocation2 + $0x88] sm:$0xff]  ;;  %vm1143_vm3 = vmpackc.low %vm146_vm0, %vm141_vm14  ;;  %vm143_vm4 = vcmp.eq.s32.totalorder %v117_v56, %v128_v39  ;;  %v1407_v59 = vld [vmem:[#allocation5 + $0x118] sm:$0xff]   ;;  %vm1574_vm14 = vmmov 0  }
  0x51   :  { %1222 = vmatpush3.bf16.msra.mxu1 %v1390_v19  ;;  %vm1149_vm6 = vmpackc.low %vm149_vm2, %vm144_vm1  ;;  %v1408_v60 = vld [vmem:[#allocation5 + $0x110] sm:$0xff]   ;;  %v109_v61 = vld [vmem:[#allocation2 + $0x20] sm:$0xff]  ;;  %vm740_vm1 = vcmask 1041409  }
  0x52   :  { %1223 = vmatprep.subr.bf16.mxu1 %v1393_v23  ;;  %v114_v62 = vld [vmem:[#allocation2 + $0x48] sm:$0xff]  ;;  %vm135_vm8 = vcmp.eq.s32.totalorder %v109_v61, %v130_v58  ;;  %v119_v63 = vld [vmem:[#allocation2 + $0x70] sm:$0xff]  ;;  %v124_v0 = vld [vmem:[#allocation2 + $0x98] sm:$0xff] }
  0x53   :  { %1196 = vmatpush3.bf16.msra.mxu0 %v1392_v22  ;;  %vm140_vm9 = vcmp.eq.s32.totalorder %v114_v62, %v130_v58  ;;  %v1409_v1 = vld [vmem:[#allocation5 + $0x108] sm:$0xff]   ;;  %vm150_vm12 = vcmp.eq.s32.totalorder %v124_v0, %v130_v58  ;;  %v1410_v2 = vld [vmem:[#allocation5 + $0x100] sm:$0xff]   ;;  %v1411_v3 = vld [vmem:[#allocation7 + $0x38] sm:$0xff]  }
  0x54   :  { %1197 = vmatprep.subr.bf16.mxu0 %v1395_v25  ;;  %vm1153_vm10 = vmpackc.low %vm140_vm9, %vm135_vm8  ;;  %v1412_v5 = vld [vmem:[#allocation7 + $0x30] sm:$0xff]   ;;  %v1413_v6 = vld [vmem:[#allocation7 + $0x28] sm:$0xff]  }
  0x55   :  { %1224 = vmatpush3.bf16.msra.mxu1 %v1394_v24  ;;  %v1414_v7 = vld [vmem:[#allocation7 + $0x20] sm:$0xff]   ;;  %v1415_v8 = vld [vmem:[#allocation7 + $0x18] sm:$0xff]   ;;  %v1416_v9 = vld [vmem:[#allocation7 + $0x10] sm:$0xff]  }
  0x56   :  { %1225 = vmatprep.subr.bf16.mxu1 %v1397_v28  ;;  %v1417_v10 = vld [vmem:[#allocation7 + $0x8] sm:$0xff]   ;;  %v1418_v11 = vld [vmem:[#allocation7] sm:$0xff]   ;;  %v1419_v12 = vld [vmem:[#allocation8 + $0x38] sm:$0xff]  }
  0x57   :  { %1198 = vmatpush3.bf16.msra.mxu0 %v1396_v27  ;;  %v1420_v13 = vld [vmem:[#allocation8 + $0x30] sm:$0xff]   ;;  %v1421_v14 = vld [vmem:[#allocation8 + $0x28] sm:$0xff]   ;;  %v1422_v15 = vld [vmem:[#allocation8 + $0x20] sm:$0xff]  }
  0x58   :  { %1199 = vmatprep.subr.bf16.mxu0 %v1399_v30  ;;  %v1423_v16 = vld [vmem:[#allocation8 + $0x18] sm:$0xff]   ;;  %v1424_v17 = vld [vmem:[#allocation8 + $0x10] sm:$0xff]   ;;  %v1096_v36 = vld [vmem:[%s1730_s2] ss:$0 sm:$0xff] }
  0x59   :  { %1226 = vmatpush3.bf16.msra.mxu1 %v1398_v29  ;;  %v1157_v55 = vld [vmem:[%s1731_s3] ss:$0 sm:$0xff] }
  0x5a   :  { %1227 = vmatprep.subr.bf16.mxu1 %v1401_v33 }
  0x5b   :  { %1200 = vmatpush3.bf16.msra.mxu0 %v1400_v32 }
  0x5c   :  { %1278 = vmatprep.subr.bf16.mxu0 %v1403_v42 }
  0x5d   :  { %1228 = vmatpush3.bf16.msra.mxu1 %v1402_v37 }
  0x5e   :  { %1140 = vmatmul.mubr.msk.bf16.vlgmr.msra.gmra.mxu0 %vm1139_vm5, %v1572_v41  ;;  %vm148_vm5 = vcmp.eq.s32.totalorder %v122_v57, %v128_v39  ;;  %1298 = vmatprep.subr.bf16.mxu1 %v1573_v4 }
  0x5f   :  { %1279 = vmatpush3.bf16.msra.mxu0 %v1403_v42  ;;  %1142 = vmatprep.mubr.msk.bf16.mxu0 %vm1141_vm15, %v1572_v41  ;;  %vm1151_vm7 = vmpackc.low %vm148_vm5, %vm143_vm4 }
  0x60   :  { %1148 = vmatmul.mubr.msk.bf16.vlgmr.msra.gmra.mxu1 %vm1147_vm11, %v1572_v41  ;;  %1280 = vmatprep.subr.bf16.mxu0 %v1404_v47  ;;  %vm145_vm11 = vcmp.eq.s32.totalorder %v119_v63, %v130_v58 }
  0x61   :  { %1150 = vmatprep.mubr.msk.bf16.mxu1 %vm1149_vm6, %v1572_v41  ;;  %vm1155_vm13 = vmpackc.low %vm150_vm12, %vm145_vm11  ;;  %1299 = vmatpush3.bf16.msra.mxu1 %v1411_v3 }
  0x62   :  { %1300 = vmatprep.subr.bf16.mxu1 %v1573_v4 }
  0x63   :  { %1281 = vmatpush3.bf16.msra.mxu0 %v1404_v47 }
  0x64   :  { %1282 = vmatprep.subr.bf16.mxu0 %v1405_v48 }
  0x65   :  { %1301 = vmatpush3.bf16.msra.mxu1 %v1412_v5 }
  0x66   :  { %1144 = vmatmul.mubr.msk.bf16.gmra.mxu0 %vm1143_vm3, %v1572_v41  ;;  %1302 = vmatprep.subr.bf16.mxu1 %v1573_v4 }
  0x67   :  { %1283 = vmatpush3.bf16.msra.mxu0 %v1405_v48  ;;  %1294 = vmatprep.mubr.msk.bf16.mxu0 %vm1153_vm10, %v1572_v41  ;;  %v680_v48 = vshrl.u32 %v125_v21, 7 }
  0x68   :  { %1284 = vmatprep.subr.bf16.mxu0 %v1406_v49  ;;  %1152 = vmatmul.mubr.msk.bf16.gmra.mxu1 %vm1151_vm7, %v1572_v41 }
  0x69   :  { %1303 = vmatpush3.bf16.msra.mxu1 %v1413_v6  ;;  %1314 = vmatprep.mubr.msk.bf16.mxu1 %vm1574_vm14, %v1573_v4  ;;  %v681_v54 = vadd.s32 8, %v680_v48  ;;  %vm687_vm15 = vcmp.lt.s32.totalorder %v680_v48, %v1157_v55 }
  0x6a   :  { %1304 = vmatprep.subr.bf16.mxu1 %v1573_v4 }
  0x6b   :  { %1285 = vmatpush3.bf16.msra.mxu0 %v1406_v49  ;;  %vm688_vm0 = vcmp.lt.s32.totalorder %v681_v54, %v1157_v55  ;;  %v1176_v54 = vld [vmem:[%s1737_s9] ss:$0 sm:$0xff] }
  0x6c   :  { %1286 = vmatprep.subr.bf16.mxu0 %v1407_v59 }
  0x6d   :  { %1305 = vmatpush3.bf16.msra.mxu1 %v1414_v7 }
  0x6e   :  { %1306 = vmatprep.subr.bf16.mxu1 %v1573_v4 }
  0x6f   :  { %1287 = vmatpush3.bf16.msra.mxu0 %v1407_v59 }
  0x70   :  { %1288 = vmatprep.subr.bf16.mxu0 %v1408_v60 }
  0x71   :  { %1307 = vmatpush3.bf16.msra.mxu1 %v1415_v8 }
  0x72   :  { %1308 = vmatprep.subr.bf16.mxu1 %v1573_v4 }
  0x73   :  { %1289 = vmatpush3.bf16.msra.mxu0 %v1408_v60 }
  0x74   :  { %1290 = vmatprep.subr.bf16.mxu0 %v1409_v1 }
  0x75   :  { %1309 = vmatpush3.bf16.msra.mxu1 %v1416_v9 }
  0x76   :  { %1310 = vmatprep.subr.bf16.mxu1 %v1573_v4 }
  0x77   :  { %1291 = vmatpush3.bf16.msra.mxu0 %v1409_v1 }
  0x78   :  { %1292 = vmatprep.subr.bf16.mxu0 %v1410_v2 }
  0x79   :  { %1311 = vmatpush3.bf16.msra.mxu1 %v1417_v10 }
  0x7a   :  { %1312 = vmatprep.subr.bf16.mxu1 %v1573_v4 }
  0x7b   :  { %1293 = vmatpush3.bf16.msra.mxu0 %v1410_v2 }
  0x7c   :  { %1318 = vmatprep.subr.bf16.mxu0 %v1573_v4 }
  0x7d   :  { %1313 = vmatpush3.bf16.msra.mxu1 %v1418_v11 }
  0x7e   :  { %1295 = vmatmul.mubr.msk.bf16.vlgmr.msra.gmra.mxu0 %vm1155_vm13, %v1572_v41  ;;  %1338 = vmatprep.subr.bf16.mxu1 %v1573_v4 }
  0x7f   :  { %1334 = vmatprep.mubr.msk.bf16.mxu0 %vm1574_vm14, %v1573_v4  ;;  %1319 = vmatpush3.bf16.msra.mxu0 %v1419_v12 }
  0x80   :  { %1320 = vmatprep.subr.bf16.mxu0 %v1573_v4 }
  0x83   :  { %1321 = vmatpush3.bf16.msra.mxu0 %v1420_v13 }
  0x84   :  { %1322 = vmatprep.subr.bf16.mxu0 %v1573_v4 }
  0x87   :  { %1323 = vmatpush3.bf16.msra.mxu0 %v1421_v14 }
  0x88   :  { %1324 = vmatprep.subr.bf16.mxu0 %v1573_v4 }
  0x8b   :  { %1325 = vmatpush3.bf16.msra.mxu0 %v1422_v15 }
  0x8c   :  { %1326 = vmatprep.subr.bf16.mxu0 %v1573_v4 }
  0x8f   :  { %1327 = vmatpush3.bf16.msra.mxu0 %v1423_v16 }
  0x90   :  { %1328 = vmatprep.subr.bf16.mxu0 %v1573_v4 }
  0x93   :  { %1329 = vmatpush3.bf16.msra.mxu0 %v1424_v17 }
  0x94   :  { %1330 = vmatprep.subr.bf16.mxu0 %v1573_v4 }
 0x11e   :  { %v1201_v18 = vpop.f32.mrf.mxu0 }
 0x120   :  { %v1202_v19 = vpop.f32.mrf.mxu0  ;;  %v1229_v20 = vpop.f32.mrf.mxu1 }
 0x121   :  { %v1203_v35 = vadd.f32 %v1202_v19, %v1201_v18 }
 0x122   :  { %v1204_v22 = vpop.f32.mrf.mxu0  ;;  %v1230_v23 = vpop.f32.mrf.mxu1 }
 0x123   :  { %v563_v41 = vadd.f32 %v1203_v35, %v1096_v36  ;;  %v1231_v42 = vadd.f32 %v1230_v23, %v1229_v20  ;;  %v1432_v35 = vld [vmem:[#allocation10 + $0x10] sm:$0xff]  }
 0x124   :  { %v1205_v24 = vpop.f32.mrf.mxu0  ;;  %v1232_v25 = vpop.f32.mrf.mxu1 }
 0x125   :  { %v1206_v43 = vadd.f32 %v1205_v24, %v1204_v22  ;;  %v612_v52 = vadd.f32 %v1231_v42, %v563_v41 }
 0x126   :  { %v1207_v26 = vpop.f32.mrf.mxu0  ;;  %v1233_v27 = vpop.f32.mrf.mxu1 }
 0x127   :  { %v566_v49 = vadd.f32 %v1206_v43, %v1096_v36  ;;  %v1234_v50 = vadd.f32 %v1233_v27, %v1232_v25 }
 0x128   :  { %v1208_v28 = vpop.f32.mrf.mxu0  ;;  %v1235_v29 = vpop.f32.mrf.mxu1 }
 0x129   :  { %v1209_v32 = vadd.f32 %v1208_v28, %v1207_v26  ;;  %v615_v61 = vadd.f32 %v1234_v50, %v566_v49  ;;  %v1425_v28 = vld [vmem:[#allocation8 + $0x8] sm:$0xff]  }
 0x12a   :  { %v1210_v30 = vpop.f32.mrf.mxu0  ;;  %v1236_v31 = vpop.f32.mrf.mxu1  ;;  %1331 = vmatpush3.bf16.msra.mxu0 %v1425_v28 }
 0x12b   :  { %v571_v37 = vadd.f32 %v1209_v32, %v1096_v36  ;;  %v1237_v38 = vadd.f32 %v1236_v31, %v1235_v29  ;;  %1332 = vmatprep.subr.bf16.mxu0 %v1573_v4  ;;  %v1426_v29 = vld [vmem:[#allocation8] sm:$0xff]   ;;  %v1428_v31 = vld [vmem:[#allocation10 + $0x30] sm:$0xff]   ;;  %v1429_v32 = vld [vmem:[#allocation10 + $0x28] sm:$0xff]  }
 0x12c   :  { %v1211_v33 = vpop.f32.mrf.mxu0  ;;  %v1238_v34 = vpop.f32.mrf.mxu1 }
 0x12d   :  { %v1212_v39 = vadd.f32 %v1211_v33, %v1210_v30  ;;  %v620_v46 = vadd.f32 %v1237_v38, %v571_v37  ;;  %v1427_v30 = vld [vmem:[#allocation10 + $0x38] sm:$0xff]   ;;  %v1430_v33 = vld [vmem:[#allocation10 + $0x20] sm:$0xff]  }
 0x12e   :  { %v1239_v40 = vpop.f32.mrf.mxu1  ;;  %1333 = vmatpush3.bf16.msra.mxu0 %v1426_v29 }
 0x12f   :  { %v574_v44 = vadd.f32 %v1212_v39, %v1096_v36  ;;  %v1240_v45 = vadd.f32 %v1239_v40, %v1238_v34  ;;  %v1431_v34 = vld [vmem:[#allocation10 + $0x18] sm:$0xff]   ;;  %v1158_v36 = vld [vmem:[%s1733_s5] ss:$0 sm:$0xff] }
 0x131   :  { %v623_v57 = vadd.f32 %v1240_v45, %v574_v44  ;;  %v1433_v44 = vld [vmem:[#allocation10 + $0x8] sm:$0xff]   ;;  %v1434_v45 = vld [vmem:[#allocation10] sm:$0xff]  }
 0x13e   :  { %v1296_v47 = vpop.f32.mrf.mxu0 }
 0x13f   :  { %v669_v51 = vadd.f32 %v1296_v47, %v620_v46  ;;  %v1167_v46 = vld [vmem:[%s1735_s7] ss:$0 sm:$0xff]  ;;  %s1535_s7 = scalar_lea.vmem %s1066_s25, 32 }
 0x140   :  { %v660_v53 = vpop.f32.mrf.mxu0  ;;  %p1536_p11 = scmp.ne.s32.totalorder %s1066_s25, %s1535_s7  ;;  %p1541_p13 = scmp.lt.s32.totalorder %s1535_s7, %s1535_s7 }
 0x141   :  { %v661_v56 = vadd.f32 %v660_v53, %v612_v52  ;;  %v677_v59 = vmax.f32 %v669_v51, 0.0 }
 0x142   :  { %v1297_v58 = vpop.f32.mrf.mxu0  ;;  %p1542_p0 = por %p1541_p13, %p1540_p12 }
 0x143   :  { %v672_v60 = vadd.f32 %v1297_v58, %v623_v57  ;;  %v675_v21 = vmax.f32 %v661_v56, 0.0  ;;  %v695_v1 = vsel %vm687_vm15, %v677_v59, 0.0 }
 0x144   :  { %v663_v62 = vpop.f32.mrf.mxu0  ;;  %p1543_p1 = pnand %p1542_p0, %p1536_p11 }
 0x145   :  { %v678_v63 = vmax.f32 %v672_v60, 0.0  ;;  %v664_v0 = vadd.f32 %v663_v62, %v615_v61  ;;  %v693_v6 = vsel %vm687_vm15, %v675_v21, 0.0 }
 0x147   :  { %v696_v2 = vsel %vm688_vm0, %v678_v63, 0.0  ;;  %v676_v3 = vmax.f32 %v664_v0, 0.0 }
 0x148   :  { %v704_v5 = vmax.f32 %v695_v1, %v696_v2 }
 0x149   :  { %v694_v7 = vsel %vm688_vm0, %v676_v3, 0.0 }
 0x14a   :  { %v705_v8 = vrot.slane %v704_v5, 4  ;;  %v697_v9 = vmax.f32 %v693_v6, %v694_v7 }
 0x14c   :  { %v706_v10 = vmax.f32 %v704_v5, %v705_v8  ;;  %v698_v11 = vrot.slane %v697_v9, 4 }
 0x14e   :  { %v707_v12 = vrot.slane %v706_v10, 2  ;;  %v699_v13 = vmax.f32 %v697_v9, %v698_v11 }
 0x150   :  { %v708_v14 = vmax.f32 %v706_v10, %v707_v12  ;;  %v700_v15 = vrot.slane %v699_v13, 2 }
 0x152   :  { %v709_v16 = vrot.slane %v708_v14, 1  ;;  %v701_v17 = vmax.f32 %v699_v13, %v700_v15 }
 0x154   :  { %v710_v18 = vmax.f32 %v708_v14, %v709_v16  ;;  %v702_v19 = vrot.slane %v701_v17, 1 }
 0x156   :  { %v712_v20 = vpack.c.bf16 %v710_v18, %v710_v18  ;;  %v703_v22 = vmax.f32 %v701_v17, %v702_v19 }
 0x158   :  { %v711_v23 = vpack.c.bf16 %v703_v22, %v703_v22  ;;  %v739_v24 = vunpack.c.l.b16 %v712_v20 }
 0x15a   :  { %v738_v25 = vunpack.c.l.b16 %v711_v23 }
 0x15c   :  { %v741_v26 = vsel %vm740_vm1, %v739_v24, %v738_v25 }
 0x15d   :  { %v742_v27 = vpack.c.b16 %v741_v26, %v741_v26 }
 0x15f   :  { %1315 = vmatmul.mubr.bf16.vlgmr.msra.gmra.mxu1 %v742_v27 }
 0x160   :  { %1354 = vmatprep.mubr.msk.bf16.mxu1 %vm1574_vm14, %v1573_v4  ;;  %1339 = vmatpush3.bf16.msra.mxu1 %v1427_v30 }
 0x161   :  { %1340 = vmatprep.subr.bf16.mxu1 %v1573_v4 }
 0x164   :  { %1341 = vmatpush3.bf16.msra.mxu1 %v1428_v31 }
 0x165   :  { %1342 = vmatprep.subr.bf16.mxu1 %v1573_v4 }
 0x168   :  { %1343 = vmatpush3.bf16.msra.mxu1 %v1429_v32 }
 0x169   :  { %1344 = vmatprep.subr.bf16.mxu1 %v1573_v4 }
 0x16c   :  { %1345 = vmatpush3.bf16.msra.mxu1 %v1430_v33 }
 0x16d   :  { %1346 = vmatprep.subr.bf16.mxu1 %v1573_v4 }
 0x170   :  { %1347 = vmatpush3.bf16.msra.mxu1 %v1431_v34 }
 0x171   :  { %1348 = vmatprep.subr.bf16.mxu1 %v1573_v4 }
 0x174   :  { %1349 = vmatpush3.bf16.msra.mxu1 %v1432_v35 }
 0x175   :  { %1350 = vmatprep.subr.bf16.mxu1 %v1573_v4 }
 0x178   :  { %1351 = vmatpush3.bf16.msra.mxu1 %v1433_v44 }
 0x179   :  { %1352 = vmatprep.subr.bf16.mxu1 %v1573_v4 }
 0x17c   :  { %1353 = vmatpush3.bf16.msra.mxu1 %v1434_v45 }
 0x21f   :  { %v826_v37 = vpop.f32.mrf.mxu1 }
 0x220   :  { %v827_v38 = vadd.f32 %v1158_v36, %v826_v37 }
 0x221   :  { %v1316_v39 = vpop.f32.mrf.mxu1 }
 0x222   :  { %v832_v40 = vmax.f32 %v827_v38, 0.0 }
 0x223   :  { %v829_v41 = vpop.f32.mrf.mxu1 }
 0x224   :  { %v833_v42 = vpack.c.bf16 %v832_v40, %v832_v40 }
 0x225   :  { %v1317_v43 = vpop.f32.mrf.mxu1 }
 0x226   :  { %1335 = vmatmul.mubr.bf16.vlgmr.msra.gmra.mxu0 %v833_v42 }
 0x2e6   :  { %v939_v47 = vpop.f32.mrf.mxu0 }
 0x2e7   :  { %v940_v48 = vadd.f32 %v1167_v46, %v939_v47 }
 0x2e8   :  { %v1336_v49 = vpop.f32.mrf.mxu0 }
 0x2e9   :  { %v945_v50 = vmax.f32 %v940_v48, 0.0 }
 0x2ea   :  { %v942_v51 = vpop.f32.mrf.mxu0 }
 0x2eb   :  { %v946_v52 = vpack.c.bf16 %v945_v50, %v945_v50 }
 0x2ec   :  { %v1337_v53 = vpop.f32.mrf.mxu0 }
 0x2ed   :  { %1355 = vmatmul.mubr.bf16.vlgmr.msra.gmra.mxu1 %v946_v52 }
 0x3ad   :  { %v1052_v4 = vpop.f32.mrf.mxu1 }
 0x3ae   :  { %v1053_v55 = vadd.f32 %v1176_v54, %v1052_v4 }
 0x3af   :  { %v1356_v56 = vpop.f32.mrf.mxu1 }
 0x3b0   :  { %1058 = vst [vmem:[#allocation11] sm:$0x3] %v1053_v55 }
 0x3b1   :  { %v1055_v57 = vpop.f32.mrf.mxu1 }
 0x3b2   :  { %1546 = shalt.err (!%p1543_p1)
}
 0x3b3   :  { %1068 = dma.vmem_to_hbm [thread:$0]  %s1066_s25, 32, %s1738_s10, [#allocation4]   ;;  %v1357_v58 = vpop.f32.mrf.mxu1 }
 0x3b4   :  { %1561 = dma.done.wait [#allocation4], 32  }
 0x3b5   :  { %1562 = vsyncadd [#allocation4], 4294967264 }
 0x3b6   :  { %1072 = vsyncpa [#allocation3], 1 }
 0x3b7   :  { %1073 = vsyncpa [#allocation6], 1 }
 0x3b8   :  { %1074 = vsyncpa [#allocation9], 1 }
 0x3b9   :  { %1075 = vsyncpa [#allocation4], 1 }

</bundles_post_ra>
